<compile_context>
chip_gen: v7x
topology: tpu7x:2x2x1
jax: 0.10.0
libtpu: 0.0.40
codegen_flags: <defaults>
</compile_context>

<pallas_src>
import functools

import jax
import jax.numpy as jnp
from jax.experimental import pallas as pl
from jax.experimental.pallas import tpu as pltpu

LANE = 128        # TPU lane width (last dim)
ROW_TILE = 16     # bf16 sublane packing: 16 rows per vreg


def _round_up(n, m):
    return ((n + m - 1) // m) * m


def _pad2d(a, rows, cols):
    return jnp.pad(a, ((0, rows - a.shape[0]), (0, cols - a.shape[1])))


def dqn_mlp_kernel(x_ref, w1_ref, b1_ref, w2_ref, b2_ref, w3_ref, b3_ref, o_ref):
    cdt = w1_ref.dtype  # bfloat16 compute dtype
    # f32 -> bf16 cast happens in-kernel (no extra HBM pass in the wrapper).
    x = x_ref[...].astype(cdt)

    # Layer 1: Linear (MXU, f32 accumulation) + bias/ReLU epilogue in bf16.
    h1 = jnp.dot(x, w1_ref[...], preferred_element_type=jnp.float32)
    h1 = jnp.maximum(h1.astype(cdt) + b1_ref[...], 0)

    # Layer 2: Linear + ReLU.
    h2 = jnp.dot(h1, w2_ref[...], preferred_element_type=jnp.float32)
    h2 = jnp.maximum(h2.astype(cdt) + b2_ref[...], 0)

    # Layer 3: Linear (Q-values, no activation); keep f32 for the output.
    out = jnp.dot(h2, w3_ref[...], preferred_element_type=jnp.float32)
    o_ref[...] = (out + b3_ref[...]).astype(o_ref.dtype)


@functools.partial(jax.jit, static_argnames=("tm",))
def dqn_forward(x, params, *, tm=1024):
    """x: (B, input_dim) float32. params: weights stored as (in, out), biases (1, out)."""
    w1, b1 = params["w1"], params["b1"]
    w2, b2 = params["w2"], params["b2"]
    w3, b3 = params["w3"], params["b3"]

    B, in_dim = x.shape
    hid = w1.shape[1]
    out_dim = w3.shape[1]

    # Only the hidden dim is padded (lane-dense resident weights + intermediates).
    # in_dim / out_dim stay at their true sizes: block last dim == full array dim.
    hid_p = _round_up(hid, LANE)

    # Batch tiling: even split, TM multiple of 16, >= 2 grid steps when possible
    # so v7x's two TensorCores both get work ("parallel" batch axis).
    b16 = _round_up(B, ROW_TILE)
    min_steps = 2 if b16 >= 2 * ROW_TILE else 1
    n_steps = max(pl.cdiv(b16, tm), min_steps)
    TM = _round_up(pl.cdiv(b16, n_steps), ROW_TILE)
    b_p = _round_up(b16, TM)
    grid = (b_p // TM,)

    compute_dtype = jnp.bfloat16

    # x: pad batch rows only if needed (no feature padding, no dtype pass).
    x_p = jnp.pad(x, ((0, b_p - B), (0, 0))) if b_p != B else x

    # Weights/biases: tiny one-time pad+cast; they stay VMEM-resident.
    w1_p = _pad2d(w1, in_dim, hid_p).astype(compute_dtype)
    w2_p = _pad2d(w2, hid_p, hid_p).astype(compute_dtype)
    w3_p = _pad2d(w3, hid_p, out_dim).astype(compute_dtype)
    b1_p = _pad2d(b1, 1, hid_p).astype(compute_dtype)
    b2_p = _pad2d(b2, 1, hid_p).astype(compute_dtype)
    b3_p = b3.astype(jnp.float32)

    const_spec = lambda a: pl.BlockSpec(a.shape, lambda i: (0, 0))

    # Cost estimate with padded compute and actual bytes moved.
    flops = 2 * b_p * (in_dim * hid_p + hid_p * hid_p + hid_p * out_dim)
    bytes_accessed = (
        b_p * in_dim * 4                                     # x read (f32)
        + (w1_p.size + w2_p.size + w3_p.size) * 2            # bf16 weights
        + (b1_p.size + b2_p.size) * 2 + b3_p.size * 4        # biases
        + b_p * out_dim * 4                                  # output write (f32)
    )

    # VMEM footprint: resident weights + double-buffered x/out blocks + intermediates.
    weight_vmem = 2 * (w1_p.size + w2_p.size + w3_p.size + b1_p.size + b2_p.size) + 4 * b3_p.size
    act_vmem = 2 * (TM * in_dim * 4) + 2 * (TM * out_dim * 4)
    inter_vmem = 2 * (TM * hid_p * 4 + TM * hid_p * 2)
    vmem_needed = weight_vmem + act_vmem + inter_vmem
    vmem_limit_bytes = int(min(max(2 * vmem_needed, 32 * 1024 * 1024), 56 * 1024 * 1024))

    out = pl.pallas_call(
        dqn_mlp_kernel,
        out_shape=jax.ShapeDtypeStruct((b_p, out_dim), jnp.float32),
        grid_spec=pltpu.PrefetchScalarGridSpec(
            num_scalar_prefetch=0,
            grid=grid,
            in_specs=[
                pl.BlockSpec((TM, in_dim), lambda i: (i, 0)),  # activations: pipelined
                const_spec(w1_p), const_spec(b1_p),
                const_spec(w2_p), const_spec(b2_p),
                const_spec(w3_p), const_spec(b3_p),
            ],
            out_specs=pl.BlockSpec((TM, out_dim), lambda i: (i, 0)),
        ),
        compiler_params=pltpu.CompilerParams(
            dimension_semantics=("parallel",),
            vmem_limit_bytes=vmem_limit_bytes,
        ),
        cost_estimate=pl.CostEstimate(
            flops=flops, transcendentals=0, bytes_accessed=bytes_accessed
        ),
    )(x_p, w1_p, b1_p, w2_p, b2_p, w3_p, b3_p)

    # Strip batch padding only when it exists (no feature-dim slice pass anymore).
    return out[:B] if b_p != B else out


def init_params(key, input_dim, hidden, output):
    """Deterministic init mimicking PyTorch Linear (uniform(-1/sqrt(fan_in), +))."""
    ks = jax.random.split(key, 6)

    def lin(kw, kb, fan_in, fan_out):
        bound = 1.0 / jnp.sqrt(fan_in)
        # stored as (in, out) — i.e. PyTorch weight transposed
        w = jax.random.uniform(kw, (fan_in, fan_out), jnp.float32, -bound, bound)
        b = jax.random.uniform(kb, (1, fan_out), jnp.float32, -bound, bound)
        return w, b

    w1, b1 = lin(ks[0], ks[1], input_dim, hidden)
    w2, b2 = lin(ks[2], ks[3], hidden, hidden)
    w3, b3 = lin(ks[4], ks[5], hidden, output)
    return {"w1": w1, "b1": b1, "w2": w2, "b2": b2, "w3": w3, "b3": b3}


if __name__ == "__main__":
    key = jax.random.PRNGKey(0)
    k_x, k_p = jax.random.split(key)

    B, input_dim, hidden, output = 8, 16, 32, 4
    x = jax.random.normal(k_x, (B, input_dim), jnp.float32)
    params = init_params(k_p, input_dim, hidden, output)

    out = dqn_forward(x, params)
    out = jax.block_until_ready(out)

    # Pure-JAX f32 reference (kernel uses bf16 operands + f32 accumulation,
    # so compare with a bf16-appropriate tolerance).
    def ref(x, p):
        h1 = jnp.maximum(x @ p["w1"] + p["b1"], 0.0)
        h2 = jnp.maximum(h1 @ p["w2"] + p["b2"], 0.0)
        return h2 @ p["w3"] + p["b3"]

    expected = ref(x, params)
    assert out.shape == (B, output), out.shape
    assert jnp.allclose(out, expected, atol=5e-2, rtol=5e-2), (
        jnp.max(jnp.abs(out - expected)))

    print("KERNEL_OK")
</pallas_src>

<mosaic_0001>
module attributes {stable_mosaic.version = 11 : i64} {
  func.func @dqn_mlp_kernel(%arg0: i32, %arg1: memref<16x16xf32, #tpu.memory_space<vmem>>, %arg2: memref<16x128xbf16, #tpu.memory_space<vmem>>, %arg3: memref<1x128xbf16, #tpu.memory_space<vmem>>, %arg4: memref<128x128xbf16, #tpu.memory_space<vmem>>, %arg5: memref<1x128xbf16, #tpu.memory_space<vmem>>, %arg6: memref<128x4xbf16, #tpu.memory_space<vmem>>, %arg7: memref<1x4xf32, #tpu.memory_space<vmem>>, %arg8: memref<16x4xf32, #tpu.memory_space<vmem>>) attributes {dimension_semantics = [#tpu.dimension_semantics<parallel>], iteration_bounds = array<i64: 1>, scalar_prefetch = 0 : i64, scratch_operands = 0 : i64, tpu.core_type = #tpu.core_type<tc>, window_params = [{transform_indices = @transform_0, window_bounds = array<i64: 16, 16>}, {pipeline_mode = #tpu.pipeline_mode<synchronous>, transform_indices = @transform_1, window_bounds = array<i64: 16, 128>}, {pipeline_mode = #tpu.pipeline_mode<synchronous>, transform_indices = @transform_2, window_bounds = array<i64: 1, 128>}, {pipeline_mode = #tpu.pipeline_mode<synchronous>, transform_indices = @transform_3, window_bounds = array<i64: 128, 128>}, {pipeline_mode = #tpu.pipeline_mode<synchronous>, transform_indices = @transform_4, window_bounds = array<i64: 1, 128>}, {pipeline_mode = #tpu.pipeline_mode<synchronous>, transform_indices = @transform_5, window_bounds = array<i64: 128, 4>}, {pipeline_mode = #tpu.pipeline_mode<synchronous>, transform_indices = @transform_6, window_bounds = array<i64: 1, 4>}, {transform_indices = @transform_7, window_bounds = array<i64: 16, 4>}]} {
    %c0 = arith.constant 0 : index
    %c0_0 = arith.constant 0 : index
    %0 = vector.load %arg1[%c0, %c0_0] : memref<16x16xf32, #tpu.memory_space<vmem>>, vector<16x16xf32>
    %1 = arith.truncf %0 : vector<16x16xf32> to vector<16x16xbf16>
    %c0_1 = arith.constant 0 : index
    %c0_2 = arith.constant 0 : index
    %2 = vector.load %arg2[%c0_1, %c0_2] : memref<16x128xbf16, #tpu.memory_space<vmem>>, vector<16x128xbf16>
    %cst = arith.constant dense<0.000000e+00> : vector<16x128xf32>
    %3 = tpu.matmul %1, %2, %cst {dimension_numbers = #tpu.dot_dimension_numbers<[1], [0], [0], [1], [0, 0, 1, 1], [], []>} : vector<16x16xbf16>, vector<16x128xbf16>, vector<16x128xf32> -> vector<16x128xf32>
    %4 = arith.truncf %3 : vector<16x128xf32> to vector<16x128xbf16>
    %c0_3 = arith.constant 0 : index
    %c0_4 = arith.constant 0 : index
    %5 = vector.load %arg3[%c0_3, %c0_4] : memref<1x128xbf16, #tpu.memory_space<vmem>>, vector<1x128xbf16>
    %6 = vector.broadcast %5 : vector<1x128xbf16> to vector<16x128xbf16>
    %7 = arith.addf %4, %6 : vector<16x128xbf16>
    %cst_5 = arith.constant 0.000000e+00 : bf16
    %8 = vector.broadcast %cst_5 : bf16 to vector<16x128xbf16>
    %9 = arith.maximumf %7, %8 : vector<16x128xbf16>
    %c0_6 = arith.constant 0 : index
    %c0_7 = arith.constant 0 : index
    %10 = vector.load %arg4[%c0_6, %c0_7] : memref<128x128xbf16, #tpu.memory_space<vmem>>, vector<128x128xbf16>
    %cst_8 = arith.constant dense<0.000000e+00> : vector<16x128xf32>
    %11 = tpu.matmul %9, %10, %cst_8 {dimension_numbers = #tpu.dot_dimension_numbers<[1], [0], [0], [1], [0, 0, 1, 1], [], []>} : vector<16x128xbf16>, vector<128x128xbf16>, vector<16x128xf32> -> vector<16x128xf32>
    %12 = arith.truncf %11 : vector<16x128xf32> to vector<16x128xbf16>
    %c0_9 = arith.constant 0 : index
    %c0_10 = arith.constant 0 : index
    %13 = vector.load %arg5[%c0_9, %c0_10] : memref<1x128xbf16, #tpu.memory_space<vmem>>, vector<1x128xbf16>
    %14 = vector.broadcast %13 : vector<1x128xbf16> to vector<16x128xbf16>
    %15 = arith.addf %12, %14 : vector<16x128xbf16>
    %cst_11 = arith.constant 0.000000e+00 : bf16
    %16 = vector.broadcast %cst_11 : bf16 to vector<16x128xbf16>
    %17 = arith.maximumf %15, %16 : vector<16x128xbf16>
    %c0_12 = arith.constant 0 : index
    %c0_13 = arith.constant 0 : index
    %18 = vector.load %arg6[%c0_12, %c0_13] : memref<128x4xbf16, #tpu.memory_space<vmem>>, vector<128x4xbf16>
    %cst_14 = arith.constant dense<0.000000e+00> : vector<16x4xf32>
    %19 = tpu.matmul %17, %18, %cst_14 {dimension_numbers = #tpu.dot_dimension_numbers<[1], [0], [0], [1], [0, 0, 1, 1], [], []>} : vector<16x128xbf16>, vector<128x4xbf16>, vector<16x4xf32> -> vector<16x4xf32>
    %c0_15 = arith.constant 0 : index
    %c0_16 = arith.constant 0 : index
    %20 = vector.load %arg7[%c0_15, %c0_16] : memref<1x4xf32, #tpu.memory_space<vmem>>, vector<1x4xf32>
    %21 = vector.broadcast %20 : vector<1x4xf32> to vector<16x4xf32>
    %22 = arith.addf %19, %21 : vector<16x4xf32>
    %c0_17 = arith.constant 0 : index
    %c0_18 = arith.constant 0 : index
    %23 = vector.load %arg8[%c0_17, %c0_18] : memref<16x4xf32, #tpu.memory_space<vmem>>, vector<16x4xf32>
    tpu.vector_store %arg8[%c0_17, %c0_18], %22 {strides = array<i32>} : memref<16x4xf32, #tpu.memory_space<vmem>>, vector<16x4xf32>,
    return
  }
  func.func @transform_0(%arg0: i32) -> (i32, i32) {
    %c0_i32 = arith.constant 0 : i32
    %c0_i32_0 = arith.constant 0 : i32
    return %arg0, %c0_i32 : i32, i32
  }
  func.func @transform_1(%arg0: i32) -> (i32, i32) {
    %c0_i32 = arith.constant 0 : i32
    %c0_i32_0 = arith.constant 0 : i32
    %c0_i32_1 = arith.constant 0 : i32
    return %c0_i32, %c0_i32_0 : i32, i32
  }
  func.func @transform_2(%arg0: i32) -> (i32, i32) {
    %c0_i32 = arith.constant 0 : i32
    %c0_i32_0 = arith.constant 0 : i32
    %c0_i32_1 = arith.constant 0 : i32
    return %c0_i32, %c0_i32_0 : i32, i32
  }
  func.func @transform_3(%arg0: i32) -> (i32, i32) {
    %c0_i32 = arith.constant 0 : i32
    %c0_i32_0 = arith.constant 0 : i32
    %c0_i32_1 = arith.constant 0 : i32
    return %c0_i32, %c0_i32_0 : i32, i32
  }
  func.func @transform_4(%arg0: i32) -> (i32, i32) {
    %c0_i32 = arith.constant 0 : i32
    %c0_i32_0 = arith.constant 0 : i32
    %c0_i32_1 = arith.constant 0 : i32
    return %c0_i32, %c0_i32_0 : i32, i32
  }
  func.func @transform_5(%arg0: i32) -> (i32, i32) {
    %c0_i32 = arith.constant 0 : i32
    %c0_i32_0 = arith.constant 0 : i32
    %c0_i32_1 = arith.constant 0 : i32
    return %c0_i32, %c0_i32_0 : i32, i32
  }
  func.func @transform_6(%arg0: i32) -> (i32, i32) {
    %c0_i32 = arith.constant 0 : i32
    %c0_i32_0 = arith.constant 0 : i32
    %c0_i32_1 = arith.constant 0 : i32
    return %c0_i32, %c0_i32_0 : i32, i32
  }
  func.func @transform_7(%arg0: i32) -> (i32, i32) {
    %c0_i32 = arith.constant 0 : i32
    %c0_i32_0 = arith.constant 0 : i32
    return %arg0, %c0_i32 : i32, i32
  }
}

</mosaic_0001>

<bundles_post_ra>
// kernel: dqn_forward.1
= control target key start
LH: loop header
LB: loop body
LE: loop exit
PB: predicated region body
PF: predicated region fallthrough
CT: control target
= control target key end

     0   :  { %v434_v0 = vmov 0.0   ;;  %vm435_vm0 = vmmov 0   ;;  %vm38_vm1 = vcmask 130048   ;;  %v88_v19 = vlaneseq  ;;  %s569_s1 = inlined_call_operand.vmem [shape: bf16[16,128], index: 1, kind: input, shape index: {}]   ;;  %s570_s0 = inlined_call_operand.vmem [shape: f32[16,16], index: 0, kind: input, shape index: {}]   ;;  %s571_s3 = inlined_call_operand.vmem [shape: bf16[128,128], index: 3, kind: input, shape index: {}]   ;;  %s572_s5 = inlined_call_operand.vmem [shape: bf16[128,4], index: 5, kind: input, shape index: {}]   ;;  %s573_s2 = inlined_call_operand.vmem [shape: bf16[1,128], index: 2, kind: input, shape index: {}]   ;;  %s574_s4 = inlined_call_operand.vmem [shape: bf16[1,128], index: 4, kind: input, shape index: {}]   ;;  %s575_s6 = inlined_call_operand.vmem [shape: f32[1,4], index: 6, kind: input, shape index: {}]   ;;  %s576_s7 = inlined_call_operand.vmem [shape: f32[16,4], index: 7, kind: output, shape index: {}]  }
   0x1   :  { %368 = vmatprep.subr.bf16.mxu0 %v434_v0  ;;  %v417_v1 = vld [vmem:[%s569_s1] sm:$0xff]   ;;  %370 = vmatprep.mubr.msk.bf16.mxu0 %vm435_vm0, %v434_v0  ;;  %v28_v3 = vld [vmem:[%s570_s0 + $0x8] sm:$0xff]  ;;  %v420_v7 = vld [vmem:[%s571_s3 + $0x10] sm:$0xff]   ;;  %v436_v31 = vmov 0   ;;  %vm322_vm2 = vcmask 31744  }
   0x2   :  { %v27_v2 = vld [vmem:[%s570_s0] sm:$0xff]  ;;  %374 = vmatprep.subr.bf16.mxu1 %v434_v0  ;;  %390 = vmatprep.mubr.msk.bf16.mxu1 %vm435_vm0, %v434_v0  ;;  %v419_v6 = vld [vmem:[%s571_s3 + $0x8] sm:$0xff]   ;;  %v421_v8 = vld [vmem:[%s571_s3 + $0x18] sm:$0xff]   ;;  %v89_v20 = vshrl.u32 %v88_v19, 7 }
   0x3   :  { %369 = vmatpush3.bf16.msra.mxu0 %v417_v1  ;;  %v29_v4 = vpack.c.bf16 %v28_v3, %v27_v2  ;;  %v418_v5 = vld [vmem:[%s571_s3] sm:$0xff]   ;;  %v423_v10 = vld [vmem:[%s571_s3 + $0x28] sm:$0xff]   ;;  %v424_v11 = vld [vmem:[%s571_s3 + $0x30] sm:$0xff]  }
   0x4   :  { %394 = vmatprep.subr.bf16.mxu0 %v434_v0  ;;  %375 = vmatpush3.bf16.msra.mxu1 %v418_v5  ;;  %v422_v9 = vld [vmem:[%s571_s3 + $0x20] sm:$0xff]   ;;  %v425_v12 = vld [vmem:[%s571_s3 + $0x38] sm:$0xff]   ;;  %v427_v14 = vld [vmem:[%s572_s5 + $0x8] sm:$0xff]   ;;  %v90_v23 = vsub.s32 0, %v89_v20 }
   0x5   :  { %376 = vmatprep.subr.bf16.mxu1 %v434_v0  ;;  %v426_v13 = vld [vmem:[%s572_s5] sm:$0xff]   ;;  %v428_v15 = vld [vmem:[%s572_s5 + $0x10] sm:$0xff]   ;;  %v429_v16 = vld [vmem:[%s572_s5 + $0x18] sm:$0xff]  }
   0x6   :  { %371 = vmatmul.mubr.msk.bf16.vlgmr.msra.gmra.mrb[0].mxu0 %vm38_vm1, %v29_v4  ;;  %v430_v17 = vld [vmem:[%s572_s5 + $0x20] sm:$0xff]   ;;  %v431_v18 = vld [vmem:[%s572_s5 + $0x28] sm:$0xff]   ;;  %v432_v33 = vld [vmem:[%s572_s5 + $0x30] sm:$0xff]  }
   0x7   :  { %410 = vmatprep.mubr.msk.bf16.mxu0 %vm435_vm0, %v434_v0  ;;  %395 = vmatpush3.bf16.msra.mxu0 %v426_v13  ;;  %v84_v21 = vld [vmem:[%s573_s2] sm:$0x1]  ;;  %v433_v34 = vld [vmem:[%s572_s5 + $0x38] sm:$0xff]  }
   0x8   :  { %377 = vmatpush3.bf16.msra.mxu1 %v419_v6  ;;  %396 = vmatprep.subr.bf16.mxu0 %v434_v0  ;;  %v86_v22 = vpack.i.b16 %v84_v21, %v84_v21  ;;  %v200_v35 = vld [vmem:[%s574_s4] sm:$0x1] }
   0x9   :  { %378 = vmatprep.subr.bf16.mxu1 %v434_v0  ;;  %v202_v36 = vpack.i.b16 %v200_v35, %v200_v35  ;;  %v339_v45 = vld [vmem:[%s575_s6] ss:$0 sm:$0xff] }
   0xa   :  { %v91_v26 = vrot.slane %v86_v22, %v90_v23 }
   0xb   :  { %397 = vmatpush3.bf16.msra.mxu0 %v427_v14  ;;  %v207_v39 = vrot.slane %v202_v36, %v90_v23 }
   0xc   :  { %379 = vmatpush3.bf16.msra.mxu1 %v420_v7  ;;  %398 = vmatprep.subr.bf16.mxu0 %v434_v0 }
   0xd   :  { %380 = vmatprep.subr.bf16.mxu1 %v434_v0 }
   0xf   :  { %399 = vmatpush3.bf16.msra.mxu0 %v428_v15 }
  0x10   :  { %381 = vmatpush3.bf16.msra.mxu1 %v421_v8  ;;  %400 = vmatprep.subr.bf16.mxu0 %v434_v0 }
  0x11   :  { %382 = vmatprep.subr.bf16.mxu1 %v434_v0 }
  0x13   :  { %401 = vmatpush3.bf16.msra.mxu0 %v429_v16 }
  0x14   :  { %383 = vmatpush3.bf16.msra.mxu1 %v422_v9  ;;  %402 = vmatprep.subr.bf16.mxu0 %v434_v0 }
  0x15   :  { %384 = vmatprep.subr.bf16.mxu1 %v434_v0 }
  0x17   :  { %403 = vmatpush3.bf16.msra.mxu0 %v430_v17 }
  0x18   :  { %385 = vmatpush3.bf16.msra.mxu1 %v423_v10  ;;  %404 = vmatprep.subr.bf16.mxu0 %v434_v0 }
  0x19   :  { %386 = vmatprep.subr.bf16.mxu1 %v434_v0 }
  0x1b   :  { %405 = vmatpush3.bf16.msra.mxu0 %v431_v18 }
  0x1c   :  { %387 = vmatpush3.bf16.msra.mxu1 %v424_v11  ;;  %406 = vmatprep.subr.bf16.mxu0 %v434_v0 }
  0x1d   :  { %388 = vmatprep.subr.bf16.mxu1 %v434_v0 }
  0x1f   :  { %407 = vmatpush3.bf16.msra.mxu0 %v432_v33 }
  0x20   :  { %389 = vmatpush3.bf16.msra.mxu1 %v425_v12  ;;  %408 = vmatprep.subr.bf16.mxu0 %v434_v0 }
  0x23   :  { %409 = vmatpush3.bf16.msra.mxu0 %v433_v34 }
  0xd9   :  { %v76_v24 = vpop.f32.mrb[0].mxu0 }
  0xda   :  { %v372_v25 = vpop.f32.mrb[1].mxu0 }
  0xdb   :  { %v79_v27 = vpop.f32.mrb[2].mxu0 }
  0xdc   :  { %v83_v28 = vpack.c.bf16 %v79_v27, %v76_v24  ;;  %v373_v29 = vpop.f32.mrb[3].mxu0 }
  0xde   :  { %v92_v30 = vadd.bf16 %v91_v26, %v83_v28 }
  0xe0   :  { %v93_v32 = vmax.bf16 %v436_v31, %v92_v30 }
  0xe2   :  { %391 = vmatmul.mubr.bf16.vlgmr.msra.gmra.mrb[0].mxu1 %v93_v32 }
 0x1b5   :  { %v192_v37 = vpop.f32.mrb[0].mxu1 }
 0x1b6   :  { %v392_v38 = vpop.f32.mrb[1].mxu1 }
 0x1b7   :  { %v195_v40 = vpop.f32.mrb[2].mxu1 }
 0x1b8   :  { %v199_v41 = vpack.c.bf16 %v195_v40, %v192_v37  ;;  %v393_v42 = vpop.f32.mrb[3].mxu1 }
 0x1ba   :  { %v208_v43 = vadd.bf16 %v207_v39, %v199_v41 }
 0x1bc   :  { %v209_v44 = vmax.bf16 %v436_v31, %v208_v43 }
 0x1be   :  { %411 = vmatmul.mubr.bf16.vlgmr.msra.gmra.mrb[4].mxu0 %v209_v44 }
 0x291   :  { %v315_v46 = vpop.f32.mrb[4].mxu0 }
 0x292   :  { %v316_v47 = vadd.f32 %v339_v45, %v315_v46  ;;  %v412_v48 = vpop.f32.mrb[5].mxu0 }
 0x293   :  { %v318_v49 = vpop.f32.mrb[6].mxu0 }
 0x294   :  { %323 = vst.msk [vmem:[%s576_s7] sm:$0xff] %vm322_vm2, %v316_v47  ;;  %v319_v50 = vadd.f32 %v339_v45, %v318_v49  ;;  %v413_v51 = vpop.f32.mrb[7].mxu0 }
 0x296   :  { %324 = vst.msk [vmem:[%s576_s7 + $0x8] sm:$0xff] %vm322_vm2, %v319_v50 }

</bundles_post_ra>
